<compile_context>
chip_gen: v5e
topology: v5e:2x2
jax: 0.10.0
libtpu: 0.0.40
codegen_flags: <defaults>
</compile_context>

<pallas_src>
import jax
import jax.numpy as jnp
from jax.experimental import pallas as pl
from jax.experimental.pallas import tpu as pltpu


def _round_up(x, m):
    return (x + m - 1) // m * m


# --------------------------------------------------------------------------- #
# Kernel
# --------------------------------------------------------------------------- #
def _make_mlp_kernel(num_layers, final_relu):
    """Kernel over refs: (x, w1, b1, ..., wN, bN, out). Weights are [in, out]."""

    def kernel(*refs):
        x_ref = refs[0]
        o_ref = refs[-1]
        wb = refs[1:-1]
        h = x_ref[...]
        for l in range(num_layers):
            w = wb[2 * l][...]
            b = wb[2 * l + 1][...]
            # MXU matmul; operands cast to the weight compute dtype (bf16) on the
            # VPU inside the kernel, f32 accumulation.
            acc = jnp.dot(h.astype(w.dtype), w, preferred_element_type=jnp.float32)
            acc = acc + b                               # bias add in f32
            last = l == num_layers - 1
            if (not last) or final_relu:
                acc = jnp.maximum(acc, 0.0)             # ReLU in f32
            # Carry intermediates in the compute dtype: halves live VMEM; the next
            # dot would round to bf16 anyway, so numerics are identical.
            h = acc if last else acc.astype(w.dtype)
        o_ref[...] = h.astype(o_ref.dtype)

    return kernel


# --------------------------------------------------------------------------- #
# Sizing helpers
# --------------------------------------------------------------------------- #
_MIN_TILE_B = 128


def _pick_tile_b(batch, max_tile_b=512, target_steps=8):
    """Whole (small) batch in one grid step; otherwise >=128-row tiles sized so
    the grid has >= target_steps steps (gives each v7x TensorCore several steps
    to overlap x/out DMA with MXU work)."""
    if batch < 2 * _MIN_TILE_B:
        return _round_up(max(batch, 8), 8)
    tile = _round_up(pl.cdiv(batch, target_steps), _MIN_TILE_B)
    return max(_MIN_TILE_B, min(max_tile_b, tile))


def _vmem_cap_bytes():
    """Generation-aware scoped-VMEM cap (~18% headroom for Mosaic scratch):
    ~105 MiB on 128 MiB parts (v5e/v6e), ~52 MiB on 64 MiB parts (v7x)."""
    try:
        capacity = int(pltpu.get_tpu_info().vmem_capacity_bytes)
    except Exception:
        capacity = 64 * 1024 * 1024      # conservative: v7x physical per-TC VMEM
    return int(capacity * 0.82)


def _vmem_needed_bytes(tile_b, d_in, x_itemsize, layers, out_itemsize, weight_bufs):
    """Resident weights (x buffer count) + double-buffered x/out tiles + the
    in-kernel activation intermediates (f32 accumulator + bf16 carry + bf16 x)."""
    weight_bytes = sum(w.size * w.dtype.itemsize + b.size * b.dtype.itemsize
                       for w, b in layers)
    compute_itemsize = layers[0][0].dtype.itemsize
    c_pad = layers[-1][0].shape[1]
    max_width = max([d_in] + [w.shape[1] for w, _ in layers])
    tiles = 2 * tile_b * d_in * x_itemsize + 2 * tile_b * c_pad * out_itemsize
    inter = (tile_b * max_width * (4 + compute_itemsize)
             + tile_b * d_in * compute_itemsize)
    return weight_bufs * weight_bytes + tiles + inter


# --------------------------------------------------------------------------- #
# pallas_call wrapper
# --------------------------------------------------------------------------- #
def _fused_call(x, layers, tile_b, *, final_relu, out_dtype, vmem_cap,
                single_buffer_weights):
    b_pad, d_in = x.shape
    c_pad = layers[-1][0].shape[1]
    grid = (b_pad // tile_b,)
    num_layers = len(layers)
    out_itemsize = jnp.dtype(out_dtype).itemsize

    flat_args = [x]
    for w, b in layers:
        flat_args += [w, b]

    flops = sum(2 * b_pad * w.shape[0] * w.shape[1] for w, _ in layers)
    bytes_accessed = (x.size * x.dtype.itemsize
                      + sum(w.size * w.dtype.itemsize + b.size * b.dtype.itemsize
                            for w, b in layers)
                      + b_pad * c_pad * out_itemsize)
    cost = pl.CostEstimate(flops=flops, transcendentals=0,
                           bytes_accessed=bytes_accessed)

    out_shape = jax.ShapeDtypeStruct((b_pad, c_pad), out_dtype)
    out_spec = pl.BlockSpec((tile_b, c_pad), lambda i: (i, 0))

    def run(weight_bufs):
        in_specs = [pl.BlockSpec((tile_b, d_in), lambda i: (i, 0))]
        for w, b in layers:
            if weight_bufs == 1:
                # Grid-invariant weights/biases: single-buffered (their index_map
                # never changes; double-buffering only doubles resident VMEM).
                in_specs.append(pl.BlockSpec(w.shape, lambda i: (0, 0),
                                             pipeline_mode=pl.Buffered(1)))
                in_specs.append(pl.BlockSpec(b.shape, lambda i: (0, 0),
                                             pipeline_mode=pl.Buffered(1)))
            else:
                in_specs.append(pl.BlockSpec(w.shape, lambda i: (0, 0)))
                in_specs.append(pl.BlockSpec(b.shape, lambda i: (0, 0)))

        needed = _vmem_needed_bytes(tile_b, d_in, x.dtype.itemsize, layers,
                                    out_itemsize, weight_bufs)
        vmem_limit = int(min(max(needed * 3 // 2, 32 * 1024 * 1024), vmem_cap))

        return pl.pallas_call(
            _make_mlp_kernel(num_layers, final_relu),
            out_shape=out_shape,
            grid_spec=pltpu.PrefetchScalarGridSpec(
                num_scalar_prefetch=0,
                grid=grid,
                in_specs=in_specs,
                out_specs=out_spec,
            ),
            compiler_params=pltpu.CompilerParams(
                dimension_semantics=("parallel",),
                vmem_limit_bytes=vmem_limit,
            ),
            cost_estimate=cost,
        )(*flat_args)

    if single_buffer_weights:
        try:
            return run(1)
        except Exception:
            # Some jax versions may reject Buffered(1); retry with default buffering.
            return run(2)
    return run(2)


def net_forward(x, prepared, *, out_dtype=jnp.float32, max_tile_b=512,
                single_buffer_weights=True):
    """Fused MLP forward.

    x:        [B, input_size] float32.
    prepared: output of `prepare_params` (bf16 weights zero-padded to 128-lane
              widths, f32 biases). Conversion/padding happens ONCE, not per call.
    """
    layers = prepared["layers"]
    c_logical = prepared["out_features"]
    B, d_in = x.shape
    if d_in != prepared["in_features"]:
        raise ValueError(f"x has {d_in} features, expected {prepared['in_features']}")

    tile_b = _pick_tile_b(B, max_tile_b)
    b_pad = _round_up(B, tile_b)
    if b_pad != B:
        x = jnp.pad(x, ((0, b_pad - B), (0, 0)))

    vmem_cap = _vmem_cap_bytes()
    out_itemsize = jnp.dtype(out_dtype).itemsize
    weight_bufs = 1 if single_buffer_weights else 2

    fits = _vmem_needed_bytes(tile_b, d_in, x.dtype.itemsize, layers,
                              out_itemsize, weight_bufs) <= vmem_cap

    if fits:
        out = _fused_call(x, layers, tile_b, final_relu=False, out_dtype=out_dtype,
                          vmem_cap=vmem_cap,
                          single_buffer_weights=single_buffer_weights)
    else:
        # Too wide for all-weights-resident: one pallas_call per layer (ReLU fused
        # into each intermediate call, bf16 lane-dense intermediates).
        h = x
        n = len(layers)
        for idx, (w, b) in enumerate(layers):
            last = idx == n - 1
            layer_dtype = out_dtype if last else w.dtype
            layer_fits = _vmem_needed_bytes(
                tile_b, h.shape[1], h.dtype.itemsize, [(w, b)],
                jnp.dtype(layer_dtype).itemsize, weight_bufs) <= vmem_cap
            if layer_fits:
                h = _fused_call(h, [(w, b)], tile_b, final_relu=not last,
                                out_dtype=layer_dtype, vmem_cap=vmem_cap,
                                single_buffer_weights=single_buffer_weights)
            else:
                # TODO(synk): tile very wide layers along their N dim with an extra
                # grid axis inside Pallas; for now hand this layer to XLA.
                acc = jnp.dot(h.astype(w.dtype), w,
                              preferred_element_type=jnp.float32) + b
                if not last:
                    acc = jnp.maximum(acc, 0.0)
                h = acc.astype(layer_dtype)
        out = h

    return out[:B, :c_logical]


# --------------------------------------------------------------------------- #
# Parameter construction / preparation
# --------------------------------------------------------------------------- #
def layer_dims(input_size, hidden_sizes, num_classes):
    """Exactly mirrors the Linear layers the PyTorch Net instantiates."""
    dims = [(input_size, hidden_sizes[0])]
    for i in range(1, len(hidden_sizes) - 1):
        dims.append((hidden_sizes[i - 1], hidden_sizes[i]))
    dims.append((hidden_sizes[-1], num_classes))
    for (a_in, a_out), (b_in, b_out) in zip(dims[:-1], dims[1:]):
        if a_out != b_in:
            raise ValueError(
                f"Net wiring inconsistent: layer out {a_out} != next layer in {b_in} "
                f"(requires hidden_sizes[-2] == hidden_sizes[-1])")
    return dims


def init_params(key, input_size, hidden_sizes, num_classes):
    """Deterministic Linear params; weights stored transposed as [in, out]."""
    params = []
    for d_in, d_out in layer_dims(input_size, hidden_sizes, num_classes):
        key, kw, kb = jax.random.split(key, 3)
        bound = 1.0 / jnp.sqrt(d_in)  # torch.nn.Linear default init range
        w_t = jax.random.uniform(kw, (d_in, d_out), jnp.float32, -bound, bound)
        b = jax.random.uniform(kb, (1, d_out), jnp.float32, -bound, bound)
        params.append((w_t, b))
    return params


def prepare_params(params, *, input_size, use_bf16=True):
    """One-time param prep: zero-pad every layer's out-width (and the next
    layer's in-rows) to a multiple of 128 lanes, convert weights to the MXU
    compute dtype (bf16). Biases stay f32 (bias add runs in f32). Padding with
    zeros keeps the math exact; padded output columns are sliced off."""
    compute_dtype = jnp.bfloat16 if use_bf16 else jnp.float32
    layers = []
    prev_out, prev_out_pad = input_size, input_size
    for w, b in params:
        d_in, d_out = w.shape
        if d_in != prev_out:
            raise ValueError(
                f"Net wiring inconsistent: layer expects {d_in} inputs but previous "
                f"layer produces {prev_out} "
                f"(requires hidden_sizes[-2] == hidden_sizes[-1])")
        d_out_pad = _round_up(d_out, 128)
        w_p = jnp.pad(w, ((0, prev_out_pad - d_in), (0, d_out_pad - d_out)))
        b_p = jnp.pad(b.reshape(1, -1), ((0, 0), (0, d_out_pad - d_out)))
        layers.append((w_p.astype(compute_dtype), b_p.astype(jnp.float32)))
        prev_out, prev_out_pad = d_out, d_out_pad
    return {"layers": layers, "in_features": input_size, "out_features": prev_out}


def net_ref(x, params, *, use_bf16=True):
    """Pure-JAX reference with the same compute precision as the kernel."""
    h = x
    n = len(params)
    for idx, (w, b) in enumerate(params):
        if use_bf16:
            acc = jnp.dot(h.astype(jnp.bfloat16), w.astype(jnp.bfloat16),
                          preferred_element_type=jnp.float32)
        else:
            acc = jnp.dot(h, w, preferred_element_type=jnp.float32)
        h = acc + b
        if idx < n - 1:
            h = jnp.maximum(h, 0.0)
    return h


if __name__ == "__main__":
    input_size = 64
    hidden_sizes = [32, 32, 32]   # Net builds Linears: 64->32, 32->32, 32->16
    num_classes = 16
    batch = 16

    key = jax.random.PRNGKey(0)
    key, kx = jax.random.split(key)
    x = jax.random.normal(kx, (batch, input_size), jnp.float32)
    params = init_params(key, input_size, hidden_sizes, num_classes)

    # One-time conversion/padding of the weights (done at init, not per forward).
    prepared = prepare_params(params, input_size=input_size, use_bf16=True)

    out = net_forward(x, prepared)
    out = jax.block_until_ready(out)

    ref = net_ref(x, params, use_bf16=True)
    assert out.shape == (batch, num_classes)
    assert jnp.allclose(out, ref, atol=2e-2, rtol=2e-2), \
        float(jnp.max(jnp.abs(out - ref)))

    print("KERNEL_OK")
</pallas_src>

<mosaic_0001>
module attributes {stable_mosaic.version = 11 : i64} {
  func.func @kernel(%arg0: i32, %arg1: memref<16x64xf32, #tpu.memory_space<vmem>>, %arg2: memref<64x128xbf16, #tpu.memory_space<vmem>>, %arg3: memref<1x128xf32, #tpu.memory_space<vmem>>, %arg4: memref<128x128xbf16, #tpu.memory_space<vmem>>, %arg5: memref<1x128xf32, #tpu.memory_space<vmem>>, %arg6: memref<128x128xbf16, #tpu.memory_space<vmem>>, %arg7: memref<1x128xf32, #tpu.memory_space<vmem>>, %arg8: memref<16x128xf32, #tpu.memory_space<vmem>>) attributes {dimension_semantics = [#tpu.dimension_semantics<parallel>], iteration_bounds = array<i64: 1>, scalar_prefetch = 0 : i64, scratch_operands = 0 : i64, tpu.core_type = #tpu.core_type<tc>, window_params = [{transform_indices = @transform_0, window_bounds = array<i64: 16, 64>}, {pipeline_mode = #tpu.pipeline_mode<synchronous>, transform_indices = @transform_1, window_bounds = array<i64: 64, 128>}, {pipeline_mode = #tpu.pipeline_mode<synchronous>, transform_indices = @transform_2, window_bounds = array<i64: 1, 128>}, {pipeline_mode = #tpu.pipeline_mode<synchronous>, transform_indices = @transform_3, window_bounds = array<i64: 128, 128>}, {pipeline_mode = #tpu.pipeline_mode<synchronous>, transform_indices = @transform_4, window_bounds = array<i64: 1, 128>}, {pipeline_mode = #tpu.pipeline_mode<synchronous>, transform_indices = @transform_5, window_bounds = array<i64: 128, 128>}, {pipeline_mode = #tpu.pipeline_mode<synchronous>, transform_indices = @transform_6, window_bounds = array<i64: 1, 128>}, {transform_indices = @transform_7, window_bounds = array<i64: 16, 128>}]} {
    %c0 = arith.constant 0 : index
    %c0_0 = arith.constant 0 : index
    %0 = vector.load %arg1[%c0, %c0_0] : memref<16x64xf32, #tpu.memory_space<vmem>>, vector<16x64xf32>
    %c0_1 = arith.constant 0 : index
    %c0_2 = arith.constant 0 : index
    %1 = vector.load %arg2[%c0_1, %c0_2] : memref<64x128xbf16, #tpu.memory_space<vmem>>, vector<64x128xbf16>
    %c0_3 = arith.constant 0 : index
    %c0_4 = arith.constant 0 : index
    %2 = vector.load %arg3[%c0_3, %c0_4] : memref<1x128xf32, #tpu.memory_space<vmem>>, vector<1x128xf32>
    %3 = arith.truncf %0 : vector<16x64xf32> to vector<16x64xbf16>
    %cst = arith.constant dense<0.000000e+00> : vector<16x128xf32>
    %4 = tpu.matmul %3, %1, %cst {dimension_numbers = #tpu.dot_dimension_numbers<[1], [0], [0], [1], [0, 0, 1, 1], [], []>} : vector<16x64xbf16>, vector<64x128xbf16>, vector<16x128xf32> -> vector<16x128xf32>
    %5 = vector.broadcast %2 : vector<1x128xf32> to vector<16x128xf32>
    %6 = arith.addf %4, %5 : vector<16x128xf32>
    %cst_5 = arith.constant 0.000000e+00 : f32
    %7 = vector.broadcast %cst_5 : f32 to vector<16x128xf32>
    %8 = arith.maximumf %6, %7 : vector<16x128xf32>
    %9 = arith.truncf %8 : vector<16x128xf32> to vector<16x128xbf16>
    %c0_6 = arith.constant 0 : index
    %c0_7 = arith.constant 0 : index
    %10 = vector.load %arg4[%c0_6, %c0_7] : memref<128x128xbf16, #tpu.memory_space<vmem>>, vector<128x128xbf16>
    %c0_8 = arith.constant 0 : index
    %c0_9 = arith.constant 0 : index
    %11 = vector.load %arg5[%c0_8, %c0_9] : memref<1x128xf32, #tpu.memory_space<vmem>>, vector<1x128xf32>
    %cst_10 = arith.constant dense<0.000000e+00> : vector<16x128xf32>
    %12 = tpu.matmul %9, %10, %cst_10 {dimension_numbers = #tpu.dot_dimension_numbers<[1], [0], [0], [1], [0, 0, 1, 1], [], []>} : vector<16x128xbf16>, vector<128x128xbf16>, vector<16x128xf32> -> vector<16x128xf32>
    %13 = vector.broadcast %11 : vector<1x128xf32> to vector<16x128xf32>
    %14 = arith.addf %12, %13 : vector<16x128xf32>
    %cst_11 = arith.constant 0.000000e+00 : f32
    %15 = vector.broadcast %cst_11 : f32 to vector<16x128xf32>
    %16 = arith.maximumf %14, %15 : vector<16x128xf32>
    %17 = arith.truncf %16 : vector<16x128xf32> to vector<16x128xbf16>
    %c0_12 = arith.constant 0 : index
    %c0_13 = arith.constant 0 : index
    %18 = vector.load %arg6[%c0_12, %c0_13] : memref<128x128xbf16, #tpu.memory_space<vmem>>, vector<128x128xbf16>
    %c0_14 = arith.constant 0 : index
    %c0_15 = arith.constant 0 : index
    %19 = vector.load %arg7[%c0_14, %c0_15] : memref<1x128xf32, #tpu.memory_space<vmem>>, vector<1x128xf32>
    %cst_16 = arith.constant dense<0.000000e+00> : vector<16x128xf32>
    %20 = tpu.matmul %17, %18, %cst_16 {dimension_numbers = #tpu.dot_dimension_numbers<[1], [0], [0], [1], [0, 0, 1, 1], [], []>} : vector<16x128xbf16>, vector<128x128xbf16>, vector<16x128xf32> -> vector<16x128xf32>
    %21 = vector.broadcast %19 : vector<1x128xf32> to vector<16x128xf32>
    %22 = arith.addf %20, %21 : vector<16x128xf32>
    %c0_17 = arith.constant 0 : index
    %c0_18 = arith.constant 0 : index
    %23 = vector.load %arg8[%c0_17, %c0_18] : memref<16x128xf32, #tpu.memory_space<vmem>>, vector<16x128xf32>
    tpu.vector_store %arg8[%c0_17, %c0_18], %22 {strides = array<i32>} : memref<16x128xf32, #tpu.memory_space<vmem>>, vector<16x128xf32>,
    return
  }
  func.func @transform_0(%arg0: i32) -> (i32, i32) {
    %c0_i32 = arith.constant 0 : i32
    %c0_i32_0 = arith.constant 0 : i32
    return %arg0, %c0_i32 : i32, i32
  }
  func.func @transform_1(%arg0: i32) -> (i32, i32) {
    %c0_i32 = arith.constant 0 : i32
    %c0_i32_0 = arith.constant 0 : i32
    %c0_i32_1 = arith.constant 0 : i32
    return %c0_i32, %c0_i32_0 : i32, i32
  }
  func.func @transform_2(%arg0: i32) -> (i32, i32) {
    %c0_i32 = arith.constant 0 : i32
    %c0_i32_0 = arith.constant 0 : i32
    %c0_i32_1 = arith.constant 0 : i32
    return %c0_i32, %c0_i32_0 : i32, i32
  }
  func.func @transform_3(%arg0: i32) -> (i32, i32) {
    %c0_i32 = arith.constant 0 : i32
    %c0_i32_0 = arith.constant 0 : i32
    %c0_i32_1 = arith.constant 0 : i32
    return %c0_i32, %c0_i32_0 : i32, i32
  }
  func.func @transform_4(%arg0: i32) -> (i32, i32) {
    %c0_i32 = arith.constant 0 : i32
    %c0_i32_0 = arith.constant 0 : i32
    %c0_i32_1 = arith.constant 0 : i32
    return %c0_i32, %c0_i32_0 : i32, i32
  }
  func.func @transform_5(%arg0: i32) -> (i32, i32) {
    %c0_i32 = arith.constant 0 : i32
    %c0_i32_0 = arith.constant 0 : i32
    %c0_i32_1 = arith.constant 0 : i32
    return %c0_i32, %c0_i32_0 : i32, i32
  }
  func.func @transform_6(%arg0: i32) -> (i32, i32) {
    %c0_i32 = arith.constant 0 : i32
    %c0_i32_0 = arith.constant 0 : i32
    %c0_i32_1 = arith.constant 0 : i32
    return %c0_i32, %c0_i32_0 : i32, i32
  }
  func.func @transform_7(%arg0: i32) -> (i32, i32) {
    %c0_i32 = arith.constant 0 : i32
    %c0_i32_0 = arith.constant 0 : i32
    return %arg0, %c0_i32 : i32, i32
  }
}

module attributes {stable_mosaic.version = 11 : i64} {
  func.func @kernel(%arg0: i32, %arg1: memref<16x64xf32, #tpu.memory_space<vmem>>, %arg2: memref<64x128xbf16, #tpu.memory_space<vmem>>, %arg3: memref<1x128xf32, #tpu.memory_space<vmem>>, %arg4: memref<128x128xbf16, #tpu.memory_space<vmem>>, %arg5: memref<1x128xf32, #tpu.memory_space<vmem>>, %arg6: memref<128x128xbf16, #tpu.memory_space<vmem>>, %arg7: memref<1x128xf32, #tpu.memory_space<vmem>>, %arg8: memref<16x128xf32, #tpu.memory_space<vmem>>) attributes {dimension_semantics = [#tpu.dimension_semantics<parallel>], iteration_bounds = array<i64: 1>, scalar_prefetch = 0 : i64, scratch_operands = 0 : i64, tpu.core_type = #tpu.core_type<tc>, window_params = [{transform_indices = @transform_0, window_bounds = array<i64: 16, 64>}, {pipeline_mode = #tpu.pipeline_mode<synchronous>, transform_indices = @transform_1, window_bounds = array<i64: 64, 128>}, {pipeline_mode = #tpu.pipeline_mode<synchronous>, transform_indices = @transform_2, window_bounds = array<i64: 1, 128>}, {pipeline_mode = #tpu.pipeline_mode<synchronous>, transform_indices = @transform_3, window_bounds = array<i64: 128, 128>}, {pipeline_mode = #tpu.pipeline_mode<synchronous>, transform_indices = @transform_4, window_bounds = array<i64: 1, 128>}, {pipeline_mode = #tpu.pipeline_mode<synchronous>, transform_indices = @transform_5, window_bounds = array<i64: 128, 128>}, {pipeline_mode = #tpu.pipeline_mode<synchronous>, transform_indices = @transform_6, window_bounds = array<i64: 1, 128>}, {transform_indices = @transform_7, window_bounds = array<i64: 16, 128>}]} {
    %c0 = arith.constant 0 : index
    %c0_0 = arith.constant 0 : index
    %0 = vector.load %arg1[%c0, %c0_0] : memref<16x64xf32, #tpu.memory_space<vmem>>, vector<16x64xf32>
    %c0_1 = arith.constant 0 : index
    %c0_2 = arith.constant 0 : index
    %1 = vector.load %arg2[%c0_1, %c0_2] : memref<64x128xbf16, #tpu.memory_space<vmem>>, vector<64x128xbf16>
    %c0_3 = arith.constant 0 : index
    %c0_4 = arith.constant 0 : index
    %2 = vector.load %arg3[%c0_3, %c0_4] : memref<1x128xf32, #tpu.memory_space<vmem>>, vector<1x128xf32>
    %3 = arith.truncf %0 : vector<16x64xf32> to vector<16x64xbf16>
    %cst = arith.constant dense<0.000000e+00> : vector<16x128xf32>
    %4 = tpu.matmul %3, %1, %cst {dimension_numbers = #tpu.dot_dimension_numbers<[1], [0], [0], [1], [0, 0, 1, 1], [], []>} : vector<16x64xbf16>, vector<64x128xbf16>, vector<16x128xf32> -> vector<16x128xf32>
    %5 = vector.broadcast %2 : vector<1x128xf32> to vector<16x128xf32>
    %6 = arith.addf %4, %5 : vector<16x128xf32>
    %cst_5 = arith.constant 0.000000e+00 : f32
    %7 = vector.broadcast %cst_5 : f32 to vector<16x128xf32>
    %8 = arith.maximumf %6, %7 : vector<16x128xf32>
    %9 = arith.truncf %8 : vector<16x128xf32> to vector<16x128xbf16>
    %c0_6 = arith.constant 0 : index
    %c0_7 = arith.constant 0 : index
    %10 = vector.load %arg4[%c0_6, %c0_7] : memref<128x128xbf16, #tpu.memory_space<vmem>>, vector<128x128xbf16>
    %c0_8 = arith.constant 0 : index
    %c0_9 = arith.constant 0 : index
    %11 = vector.load %arg5[%c0_8, %c0_9] : memref<1x128xf32, #tpu.memory_space<vmem>>, vector<1x128xf32>
    %cst_10 = arith.constant dense<0.000000e+00> : vector<16x128xf32>
    %12 = tpu.matmul %9, %10, %cst_10 {dimension_numbers = #tpu.dot_dimension_numbers<[1], [0], [0], [1], [0, 0, 1, 1], [], []>} : vector<16x128xbf16>, vector<128x128xbf16>, vector<16x128xf32> -> vector<16x128xf32>
    %13 = vector.broadcast %11 : vector<1x128xf32> to vector<16x128xf32>
    %14 = arith.addf %12, %13 : vector<16x128xf32>
    %cst_11 = arith.constant 0.000000e+00 : f32
    %15 = vector.broadcast %cst_11 : f32 to vector<16x128xf32>
    %16 = arith.maximumf %14, %15 : vector<16x128xf32>
    %17 = arith.truncf %16 : vector<16x128xf32> to vector<16x128xbf16>
    %c0_12 = arith.constant 0 : index
    %c0_13 = arith.constant 0 : index
    %18 = vector.load %arg6[%c0_12, %c0_13] : memref<128x128xbf16, #tpu.memory_space<vmem>>, vector<128x128xbf16>
    %c0_14 = arith.constant 0 : index
    %c0_15 = arith.constant 0 : index
    %19 = vector.load %arg7[%c0_14, %c0_15] : memref<1x128xf32, #tpu.memory_space<vmem>>, vector<1x128xf32>
    %cst_16 = arith.constant dense<0.000000e+00> : vector<16x128xf32>
    %20 = tpu.matmul %17, %18, %cst_16 {dimension_numbers = #tpu.dot_dimension_numbers<[1], [0], [0], [1], [0, 0, 1, 1], [], []>} : vector<16x128xbf16>, vector<128x128xbf16>, vector<16x128xf32> -> vector<16x128xf32>
    %21 = vector.broadcast %19 : vector<1x128xf32> to vector<16x128xf32>
    %22 = arith.addf %20, %21 : vector<16x128xf32>
    %c0_17 = arith.constant 0 : index
    %c0_18 = arith.constant 0 : index
    %23 = vector.load %arg8[%c0_17, %c0_18] : memref<16x128xf32, #tpu.memory_space<vmem>>, vector<16x128xf32>
    tpu.vector_store %arg8[%c0_17, %c0_18], %22 {strides = array<i32>} : memref<16x128xf32, #tpu.memory_space<vmem>>, vector<16x128xf32>,
    return
  }
  func.func @transform_0(%arg0: i32) -> (i32, i32) {
    %c0_i32 = arith.constant 0 : i32
    %c0_i32_0 = arith.constant 0 : i32
    return %arg0, %c0_i32 : i32, i32
  }
  func.func @transform_1(%arg0: i32) -> (i32, i32) {
    %c0_i32 = arith.constant 0 : i32
    %c0_i32_0 = arith.constant 0 : i32
    %c0_i32_1 = arith.constant 0 : i32
    return %c0_i32, %c0_i32_0 : i32, i32
  }
  func.func @transform_2(%arg0: i32) -> (i32, i32) {
    %c0_i32 = arith.constant 0 : i32
    %c0_i32_0 = arith.constant 0 : i32
    %c0_i32_1 = arith.constant 0 : i32
    return %c0_i32, %c0_i32_0 : i32, i32
  }
  func.func @transform_3(%arg0: i32) -> (i32, i32) {
    %c0_i32 = arith.constant 0 : i32
    %c0_i32_0 = arith.constant 0 : i32
    %c0_i32_1 = arith.constant 0 : i32
    return %c0_i32, %c0_i32_0 : i32, i32
  }
  func.func @transform_4(%arg0: i32) -> (i32, i32) {
    %c0_i32 = arith.constant 0 : i32
    %c0_i32_0 = arith.constant 0 : i32
    %c0_i32_1 = arith.constant 0 : i32
    return %c0_i32, %c0_i32_0 : i32, i32
  }
  func.func @transform_5(%arg0: i32) -> (i32, i32) {
    %c0_i32 = arith.constant 0 : i32
    %c0_i32_0 = arith.constant 0 : i32
    %c0_i32_1 = arith.constant 0 : i32
    return %c0_i32, %c0_i32_0 : i32, i32
  }
  func.func @transform_6(%arg0: i32) -> (i32, i32) {
    %c0_i32 = arith.constant 0 : i32
    %c0_i32_0 = arith.constant 0 : i32
    %c0_i32_1 = arith.constant 0 : i32
    return %c0_i32, %c0_i32_0 : i32, i32
  }
  func.func @transform_7(%arg0: i32) -> (i32, i32) {
    %c0_i32 = arith.constant 0 : i32
    %c0_i32_0 = arith.constant 0 : i32
    return %arg0, %c0_i32 : i32, i32
  }
}

</mosaic_0001>

<bundles_post_ra>
// kernel: tpu_custom_call.1
= control target key start
LH: loop header
LB: loop body
LE: loop exit
PB: predicated region body
PF: predicated region fallthrough
CT: control target
= control target key end

     0   :  { %12 = vsyncpa [#allocation3], 0  ;;  %s661_s0 = inlined_call_operand.hbm [shape: f32[16,64], index: 0, kind: input, shape index: {}]   ;;  %s662_s1 = inlined_call_operand.hbm [shape: bf16[64,128], index: 1, kind: input, shape index: {}]   ;;  %s663_s2 = inlined_call_operand.vmem [shape: f32[1,128], index: 2, kind: input, shape index: {}]   ;;  %s664_s3 = inlined_call_operand.hbm [shape: bf16[128,128], index: 3, kind: input, shape index: {}]   ;;  %s665_s4 = inlined_call_operand.vmem [shape: f32[1,128], index: 4, kind: input, shape index: {}]   ;;  %s666_s5 = inlined_call_operand.hbm [shape: bf16[128,128], index: 5, kind: input, shape index: {}]   ;;  %s667_s6 = inlined_call_operand.vmem [shape: f32[1,128], index: 6, kind: input, shape index: {}]   ;;  %s668_s7 = inlined_call_operand.hbm [shape: f32[16,128], index: 7, kind: output, shape index: {}]  }
   0x1   :  { %13 = vsyncpa [#allocation6], 0 }
   0x2   :  { %14 = vsyncpa [#allocation9], 0  ;;  %s33_s26 = sshll.u32 %s662_s1, 4  ;;  %s34_s26 = int_to_ptr.hbm [resolvable:$true] %s33_s26 }
   0x3   :  { %15 = vsyncpa [#allocation4], 0  ;;  %s582_s27 = smov [#allocation5]   ;;  %s20_s8 = sshll.u32 %s661_s0, 4  ;;  %s21_s8 = int_to_ptr.hbm [resolvable:$true] %s20_s8 }
   0x4   :  { %s35_s28 = sshll.u32 %s582_s27, 4  ;;  %s583_s9 = smov 64   ;;  %s36_s28 = int_to_ptr.vmem [resolvable:$true] %s35_s28 }
   0x5   :  { %s584_s10 = smov 4   ;;  %s585_s11 = smov [#allocation2]  }
   0x6   :  { %41 = dma.hbm_to_vmem [thread:$0]  %s34_s26, 512, %s36_s28, [#allocation6], %s583_s9, %s583_s9, %s584_s10  }
   0x7   :  { %s22_s12 = sshll.u32 %s585_s11, 4  ;;  %s586_s13 = smov 128   ;;  %s23_s12 = int_to_ptr.vmem [resolvable:$true] %s22_s12 }
   0x8   :  { %s587_s14 = smov 8   ;;  %s48_s16 = sshll.u32 %s664_s3, 4  ;;  %s49_s16 = int_to_ptr.hbm [resolvable:$true] %s48_s16 }
   0x9   :  { %28 = dma.hbm_to_vmem [thread:$0]  %s21_s8, 256, %s23_s12, [#allocation3], %s586_s13, %s586_s13, %s587_s14  }
   0xa   :  { %s588_s17 = smov [#allocation7]   ;;  %s63_s20 = sshll.u32 %s666_s5, 4  ;;  %s64_s20 = int_to_ptr.hbm [resolvable:$true] %s63_s20 }
   0xb   :  { %s50_s0 = sshll.u32 %s588_s17, 4  ;;  %s589_s21 = smov [#allocation8]   ;;  %s51_s0 = int_to_ptr.vmem [resolvable:$true] %s50_s0 }
   0xc   :  { %56 = dma.hbm_to_vmem [thread:$0]  %s49_s16, 1024, %s51_s0, [#allocation6], %s583_s9, %s583_s9, %s584_s10  }
   0xd   :  { %s65_s22 = sshll.u32 %s589_s21, 4  ;;  %s66_s22 = int_to_ptr.vmem [resolvable:$true] %s65_s22 }
   0xe   :  { %71 = dma.hbm_to_vmem [thread:$0]  %s64_s20, 1024, %s66_s22, [#allocation9], %s583_s9, %s583_s9, %s584_s10  }
   0xf   :  { %574 = dma.done.wait [#allocation3], 256  }
  0x10   :  { %575 = vsyncadd [#allocation3], 4294967040 }
  0x11   :  { %576 = dma.done.wait [#allocation6], 1536  }
  0x12   :  { %577 = vsyncadd [#allocation6], 4294965760 }
  0x13   :  { %578 = dma.done.wait [#allocation9], 1024  }
  0x14   :  { %579 = vsyncadd [#allocation9], 4294966272  ;;  %v425_v0 = vld [vmem:[#allocation5 + $0x18] sm:$0xff]  ;;  %v424_v1 = vld [vmem:[#allocation5 + $0x10] sm:$0xff]  ;;  %vm130_vm0 = vcmask 523264   ;;  %s590_s26 = smov [#allocation10]  }
  0x15   :  { %138 = vmatpush.bf16.msra.mxu0 %v425_v0  ;;  %v433_v2 = vld [vmem:[#allocation7 + $0x38] sm:$0xff]  ;;  %v432_v3 = vld [vmem:[#allocation7 + $0x30] sm:$0xff]  ;;  %v423_v4 = vld [vmem:[#allocation5 + $0x8] sm:$0xff]  ;;  %s324_s27 = sshll.u32 %s590_s26, 4  ;;  %s325_s27 = int_to_ptr.vmem [resolvable:$true] %s324_s27 }
  0x16   :  { %219 = vmatpush.bf16.msra.mxu1 %v433_v2  ;;  %v431_v5 = vld [vmem:[#allocation7 + $0x28] sm:$0xff]  ;;  %v422_v6 = vld [vmem:[#allocation5] sm:$0xff]  ;;  %v91_v7 = vld [vmem:[#allocation2] sm:$0xff] }
  0x17   :  { %v92_v8 = vld [vmem:[#allocation2 + $0x8] sm:$0xff]  ;;  %v430_v9 = vld [vmem:[#allocation7 + $0x20] sm:$0xff]  ;;  %v428_v12 = vld [vmem:[#allocation7 + $0x10] sm:$0xff] }
  0x18   :  { %v102_v10 = vpack.c.bf16 %v92_v8, %v91_v7  ;;  %v429_v11 = vld [vmem:[#allocation7 + $0x18] sm:$0xff]  ;;  %v427_v13 = vld [vmem:[#allocation7 + $0x8] sm:$0xff]  ;;  %v426_v14 = vld [vmem:[#allocation7] sm:$0xff] }
  0x19   :  { %139 = vmatpush.bf16.msra.mxu0 %v424_v1  ;;  %v441_v15 = vld [vmem:[#allocation8 + $0x38] sm:$0xff]  ;;  %v440_v16 = vld [vmem:[#allocation8 + $0x30] sm:$0xff]  ;;  %v439_v17 = vld [vmem:[#allocation8 + $0x28] sm:$0xff] }
  0x1a   :  { %220 = vmatpush.bf16.msra.mxu1 %v432_v3  ;;  %304 = vmatpush.bf16.msra.mxu2 %v441_v15  ;;  %v438_v18 = vld [vmem:[#allocation8 + $0x20] sm:$0xff]  ;;  %v451_v20 = vld [vmem:[%s663_s2] ss:$0 sm:$0xff]  ;;  %v437_v27 = vld [vmem:[#allocation8 + $0x18] sm:$0xff] }
  0x1b   :  { %v436_v28 = vld [vmem:[#allocation8 + $0x10] sm:$0xff]  ;;  %v435_v29 = vld [vmem:[#allocation8 + $0x8] sm:$0xff]  ;;  %v434_v30 = vld [vmem:[#allocation8] sm:$0xff] }
  0x1c   :  { %v452_v32 = vld [vmem:[%s665_s4] ss:$0 sm:$0xff]  ;;  %s326_s4 = sshll.u32 %s668_s7, 4  ;;  %s327_s4 = int_to_ptr.hbm [resolvable:$true] %s326_s4 }
  0x1d   :  { %140 = vmatpush.bf16.msra.mxu0 %v423_v4  ;;  %v453_v39 = vld [vmem:[%s667_s6] ss:$0 sm:$0xff] }
  0x1e   :  { %221 = vmatpush.bf16.msra.mxu1 %v431_v5  ;;  %305 = vmatpush.bf16.msra.mxu2 %v440_v16 }
  0x21   :  { %141 = vmatpush.bf16.msra.mxu0 %v422_v6 }
  0x22   :  { %222 = vmatpush.bf16.msra.mxu1 %v430_v9  ;;  %306 = vmatpush.bf16.msra.mxu2 %v439_v17 }
  0x24   :  { %357 = vmatmul.msk.bf16.vlgmr.msra.gmra.mxu0 %vm130_vm0, %v102_v10 }
  0x26   :  { %223 = vmatpush.bf16.msra.mxu1 %v429_v11  ;;  %307 = vmatpush.bf16.msra.mxu2 %v438_v18 }
  0x2a   :  { %224 = vmatpush.bf16.msra.mxu1 %v428_v12  ;;  %308 = vmatpush.bf16.msra.mxu2 %v437_v27 }
  0x2e   :  { %225 = vmatpush.bf16.msra.mxu1 %v427_v13  ;;  %309 = vmatpush.bf16.msra.mxu2 %v436_v28 }
  0x32   :  { %226 = vmatpush.bf16.msra.mxu1 %v426_v14  ;;  %310 = vmatpush.bf16.msra.mxu2 %v435_v29 }
  0x36   :  { %311 = vmatpush.bf16.msra.mxu2 %v434_v30 }
  0xa1   :  { %v143_v19 = vpop.f32.mrf.mxu0 }
  0xa2   :  { %v144_v21 = vadd.f32 %v451_v20, %v143_v19 }
  0xa4   :  { %v148_v24 = vmax.f32 %v144_v21, 0.0 }
  0xa9   :  { %v145_v22 = vpop.f32.mrf.mxu0 }
  0xaa   :  { %v146_v23 = vadd.f32 %v451_v20, %v145_v22 }
  0xac   :  { %v149_v25 = vmax.f32 %v146_v23, 0.0 }
  0xae   :  { %v150_v26 = vpack.c.bf16 %v149_v25, %v148_v24 }
  0xb0   :  { %227 = vmatmul.bf16.vlgmr.msra.gmra.mxu1 %v150_v26 }
 0x12d   :  { %v228_v31 = vpop.f32.mrf.mxu1 }
 0x12e   :  { %v229_v33 = vadd.f32 %v452_v32, %v228_v31 }
 0x130   :  { %v233_v36 = vmax.f32 %v229_v33, 0.0 }
 0x135   :  { %v230_v34 = vpop.f32.mrf.mxu1 }
 0x136   :  { %v231_v35 = vadd.f32 %v452_v32, %v230_v34 }
 0x138   :  { %v234_v37 = vmax.f32 %v231_v35, 0.0 }
 0x13a   :  { %v235_v38 = vpack.c.bf16 %v234_v37, %v233_v36 }
 0x13c   :  { %312 = vmatmul.bf16.vlgmr.msra.gmra.mxu2 %v235_v38 }
 0x1bf   :  { %v313_v40 = vpop.f32.mrf.mxu2 }
 0x1c0   :  { %v314_v41 = vadd.f32 %v453_v39, %v313_v40 }
 0x1c2   :  { %318 = vst [vmem:[#allocation10] sm:$0xff] %v314_v41 }
 0x1c7   :  { %v315_v42 = vpop.f32.mrf.mxu2 }
 0x1c8   :  { %v316_v43 = vadd.f32 %v453_v39, %v315_v42 }
 0x1ca   :  { %319 = vst [vmem:[#allocation10 + $0x8] sm:$0xff] %v316_v43 }
 0x1cb   :  { %332 = dma.vmem_to_hbm [thread:$0]  %s325_s27, 256, %s327_s4, [#allocation4], %s586_s13, %s586_s13, %s587_s14  }
 0x1cc   :  { %580 = dma.done.wait [#allocation4], 256  }
 0x1cd   :  { %581 = vsyncadd [#allocation4], 4294967040 }
 0x1ce   :  { %337 = vsyncpa [#allocation3], 1 }
 0x1cf   :  { %338 = vsyncpa [#allocation6], 1 }
 0x1d0   :  { %339 = vsyncpa [#allocation9], 1 }
 0x1d1   :  { %340 = vsyncpa [#allocation4], 1 }

// kernel: tpu_custom_call.1
= control target key start
LH: loop header
LB: loop body
LE: loop exit
PB: predicated region body
PF: predicated region fallthrough
CT: control target
= control target key end

     0   :  { %12 = vsyncpa [#allocation3], 0  ;;  %s661_s0 = inlined_call_operand.hbm [shape: f32[16,64], index: 0, kind: input, shape index: {}]   ;;  %s662_s1 = inlined_call_operand.hbm [shape: bf16[64,128], index: 1, kind: input, shape index: {}]   ;;  %s663_s2 = inlined_call_operand.vmem [shape: f32[1,128], index: 2, kind: input, shape index: {}]   ;;  %s664_s3 = inlined_call_operand.hbm [shape: bf16[128,128], index: 3, kind: input, shape index: {}]   ;;  %s665_s4 = inlined_call_operand.vmem [shape: f32[1,128], index: 4, kind: input, shape index: {}]   ;;  %s666_s5 = inlined_call_operand.hbm [shape: bf16[128,128], index: 5, kind: input, shape index: {}]   ;;  %s667_s6 = inlined_call_operand.vmem [shape: f32[1,128], index: 6, kind: input, shape index: {}]   ;;  %s668_s7 = inlined_call_operand.hbm [shape: f32[16,128], index: 7, kind: output, shape index: {}]  }
   0x1   :  { %13 = vsyncpa [#allocation6], 0 }
   0x2   :  { %14 = vsyncpa [#allocation9], 0  ;;  %s33_s26 = sshll.u32 %s662_s1, 4  ;;  %s34_s26 = int_to_ptr.hbm [resolvable:$true] %s33_s26 }
   0x3   :  { %15 = vsyncpa [#allocation4], 0  ;;  %s582_s27 = smov [#allocation5]   ;;  %s20_s8 = sshll.u32 %s661_s0, 4  ;;  %s21_s8 = int_to_ptr.hbm [resolvable:$true] %s20_s8 }
   0x4   :  { %s35_s28 = sshll.u32 %s582_s27, 4  ;;  %s583_s9 = smov 64   ;;  %s36_s28 = int_to_ptr.vmem [resolvable:$true] %s35_s28 }
   0x5   :  { %s584_s10 = smov 4   ;;  %s585_s11 = smov [#allocation2]  }
   0x6   :  { %41 = dma.hbm_to_vmem [thread:$0]  %s34_s26, 512, %s36_s28, [#allocation6], %s583_s9, %s583_s9, %s584_s10  }
   0x7   :  { %s22_s12 = sshll.u32 %s585_s11, 4  ;;  %s586_s13 = smov 128   ;;  %s23_s12 = int_to_ptr.vmem [resolvable:$true] %s22_s12 }
   0x8   :  { %s587_s14 = smov 8   ;;  %s48_s16 = sshll.u32 %s664_s3, 4  ;;  %s49_s16 = int_to_ptr.hbm [resolvable:$true] %s48_s16 }
   0x9   :  { %28 = dma.hbm_to_vmem [thread:$0]  %s21_s8, 256, %s23_s12, [#allocation3], %s586_s13, %s586_s13, %s587_s14  }
   0xa   :  { %s588_s17 = smov [#allocation7]   ;;  %s63_s20 = sshll.u32 %s666_s5, 4  ;;  %s64_s20 = int_to_ptr.hbm [resolvable:$true] %s63_s20 }
   0xb   :  { %s50_s0 = sshll.u32 %s588_s17, 4  ;;  %s589_s21 = smov [#allocation8]   ;;  %s51_s0 = int_to_ptr.vmem [resolvable:$true] %s50_s0 }
   0xc   :  { %56 = dma.hbm_to_vmem [thread:$0]  %s49_s16, 1024, %s51_s0, [#allocation6], %s583_s9, %s583_s9, %s584_s10  }
   0xd   :  { %s65_s22 = sshll.u32 %s589_s21, 4  ;;  %s66_s22 = int_to_ptr.vmem [resolvable:$true] %s65_s22 }
   0xe   :  { %71 = dma.hbm_to_vmem [thread:$0]  %s64_s20, 1024, %s66_s22, [#allocation9], %s583_s9, %s583_s9, %s584_s10  }
   0xf   :  { %574 = dma.done.wait [#allocation3], 256  }
  0x10   :  { %575 = vsyncadd [#allocation3], 4294967040 }
  0x11   :  { %576 = dma.done.wait [#allocation6], 1536  }
  0x12   :  { %577 = vsyncadd [#allocation6], 4294965760 }
  0x13   :  { %578 = dma.done.wait [#allocation9], 1024  }
  0x14   :  { %579 = vsyncadd [#allocation9], 4294966272  ;;  %v425_v0 = vld [vmem:[#allocation5 + $0x18] sm:$0xff]  ;;  %v424_v1 = vld [vmem:[#allocation5 + $0x10] sm:$0xff]  ;;  %vm130_vm0 = vcmask 523264   ;;  %s590_s26 = smov [#allocation10]  }
  0x15   :  { %138 = vmatpush.bf16.msra.mxu0 %v425_v0  ;;  %v433_v2 = vld [vmem:[#allocation7 + $0x38] sm:$0xff]  ;;  %v432_v3 = vld [vmem:[#allocation7 + $0x30] sm:$0xff]  ;;  %v423_v4 = vld [vmem:[#allocation5 + $0x8] sm:$0xff]  ;;  %s324_s27 = sshll.u32 %s590_s26, 4  ;;  %s325_s27 = int_to_ptr.vmem [resolvable:$true] %s324_s27 }
  0x16   :  { %219 = vmatpush.bf16.msra.mxu1 %v433_v2  ;;  %v431_v5 = vld [vmem:[#allocation7 + $0x28] sm:$0xff]  ;;  %v422_v6 = vld [vmem:[#allocation5] sm:$0xff]  ;;  %v91_v7 = vld [vmem:[#allocation2] sm:$0xff] }
  0x17   :  { %v92_v8 = vld [vmem:[#allocation2 + $0x8] sm:$0xff]  ;;  %v430_v9 = vld [vmem:[#allocation7 + $0x20] sm:$0xff]  ;;  %v428_v12 = vld [vmem:[#allocation7 + $0x10] sm:$0xff] }
  0x18   :  { %v102_v10 = vpack.c.bf16 %v92_v8, %v91_v7  ;;  %v429_v11 = vld [vmem:[#allocation7 + $0x18] sm:$0xff]  ;;  %v427_v13 = vld [vmem:[#allocation7 + $0x8] sm:$0xff]  ;;  %v426_v14 = vld [vmem:[#allocation7] sm:$0xff] }
  0x19   :  { %139 = vmatpush.bf16.msra.mxu0 %v424_v1  ;;  %v441_v15 = vld [vmem:[#allocation8 + $0x38] sm:$0xff]  ;;  %v440_v16 = vld [vmem:[#allocation8 + $0x30] sm:$0xff]  ;;  %v439_v17 = vld [vmem:[#allocation8 + $0x28] sm:$0xff] }
  0x1a   :  { %220 = vmatpush.bf16.msra.mxu1 %v432_v3  ;;  %304 = vmatpush.bf16.msra.mxu2 %v441_v15  ;;  %v438_v18 = vld [vmem:[#allocation8 + $0x20] sm:$0xff]  ;;  %v451_v20 = vld [vmem:[%s663_s2] ss:$0 sm:$0xff]  ;;  %v437_v27 = vld [vmem:[#allocation8 + $0x18] sm:$0xff] }
  0x1b   :  { %v436_v28 = vld [vmem:[#allocation8 + $0x10] sm:$0xff]  ;;  %v435_v29 = vld [vmem:[#allocation8 + $0x8] sm:$0xff]  ;;  %v434_v30 = vld [vmem:[#allocation8] sm:$0xff] }
  0x1c   :  { %v452_v32 = vld [vmem:[%s665_s4] ss:$0 sm:$0xff]  ;;  %s326_s4 = sshll.u32 %s668_s7, 4  ;;  %s327_s4 = int_to_ptr.hbm [resolvable:$true] %s326_s4 }
  0x1d   :  { %140 = vmatpush.bf16.msra.mxu0 %v423_v4  ;;  %v453_v39 = vld [vmem:[%s667_s6] ss:$0 sm:$0xff] }
  0x1e   :  { %221 = vmatpush.bf16.msra.mxu1 %v431_v5  ;;  %305 = vmatpush.bf16.msra.mxu2 %v440_v16 }
  0x21   :  { %141 = vmatpush.bf16.msra.mxu0 %v422_v6 }
  0x22   :  { %222 = vmatpush.bf16.msra.mxu1 %v430_v9  ;;  %306 = vmatpush.bf16.msra.mxu2 %v439_v17 }
  0x24   :  { %357 = vmatmul.msk.bf16.vlgmr.msra.gmra.mxu0 %vm130_vm0, %v102_v10 }
  0x26   :  { %223 = vmatpush.bf16.msra.mxu1 %v429_v11  ;;  %307 = vmatpush.bf16.msra.mxu2 %v438_v18 }
  0x2a   :  { %224 = vmatpush.bf16.msra.mxu1 %v428_v12  ;;  %308 = vmatpush.bf16.msra.mxu2 %v437_v27 }
  0x2e   :  { %225 = vmatpush.bf16.msra.mxu1 %v427_v13  ;;  %309 = vmatpush.bf16.msra.mxu2 %v436_v28 }
  0x32   :  { %226 = vmatpush.bf16.msra.mxu1 %v426_v14  ;;  %310 = vmatpush.bf16.msra.mxu2 %v435_v29 }
  0x36   :  { %311 = vmatpush.bf16.msra.mxu2 %v434_v30 }
  0xa1   :  { %v143_v19 = vpop.f32.mrf.mxu0 }
  0xa2   :  { %v144_v21 = vadd.f32 %v451_v20, %v143_v19 }
  0xa4   :  { %v148_v24 = vmax.f32 %v144_v21, 0.0 }
  0xa9   :  { %v145_v22 = vpop.f32.mrf.mxu0 }
  0xaa   :  { %v146_v23 = vadd.f32 %v451_v20, %v145_v22 }
  0xac   :  { %v149_v25 = vmax.f32 %v146_v23, 0.0 }
  0xae   :  { %v150_v26 = vpack.c.bf16 %v149_v25, %v148_v24 }
  0xb0   :  { %227 = vmatmul.bf16.vlgmr.msra.gmra.mxu1 %v150_v26 }
 0x12d   :  { %v228_v31 = vpop.f32.mrf.mxu1 }
 0x12e   :  { %v229_v33 = vadd.f32 %v452_v32, %v228_v31 }
 0x130   :  { %v233_v36 = vmax.f32 %v229_v33, 0.0 }
 0x135   :  { %v230_v34 = vpop.f32.mrf.mxu1 }
 0x136   :  { %v231_v35 = vadd.f32 %v452_v32, %v230_v34 }
 0x138   :  { %v234_v37 = vmax.f32 %v231_v35, 0.0 }
 0x13a   :  { %v235_v38 = vpack.c.bf16 %v234_v37, %v233_v36 }
 0x13c   :  { %312 = vmatmul.bf16.vlgmr.msra.gmra.mxu2 %v235_v38 }
 0x1bf   :  { %v313_v40 = vpop.f32.mrf.mxu2 }
 0x1c0   :  { %v314_v41 = vadd.f32 %v453_v39, %v313_v40 }
 0x1c2   :  { %318 = vst [vmem:[#allocation10] sm:$0xff] %v314_v41 }
 0x1c7   :  { %v315_v42 = vpop.f32.mrf.mxu2 }
 0x1c8   :  { %v316_v43 = vadd.f32 %v453_v39, %v315_v42 }
 0x1ca   :  { %319 = vst [vmem:[#allocation10 + $0x8] sm:$0xff] %v316_v43 }
 0x1cb   :  { %332 = dma.vmem_to_hbm [thread:$0]  %s325_s27, 256, %s327_s4, [#allocation4], %s586_s13, %s586_s13, %s587_s14  }
 0x1cc   :  { %580 = dma.done.wait [#allocation4], 256  }
 0x1cd   :  { %581 = vsyncadd [#allocation4], 4294967040 }
 0x1ce   :  { %337 = vsyncpa [#allocation3], 1 }
 0x1cf   :  { %338 = vsyncpa [#allocation6], 1 }
 0x1d0   :  { %339 = vsyncpa [#allocation9], 1 }
 0x1d1   :  { %340 = vsyncpa [#allocation4], 1 }

</bundles_post_ra>
